<compile_context>
chip_gen: v5e
topology: v5e:2x2
jax: 0.10.0
libtpu: 0.0.40
codegen_flags: <defaults>
</compile_context>

<pallas_src>
import jax
import jax.numpy as jnp
from jax.experimental import pallas as pl
from jax.experimental.pallas import tpu as pltpu

BN_EPS = 1e-5


def _pad_to(n, m):
    return -(-n // m) * m


def _layout(latent_num):
    """Static packing layout shared by the packer and the kernel builder."""
    c2 = latent_num // 2
    c3 = latent_num // 4
    assert c3 >= 1, "latent_num must be >= 4"
    cp = _pad_to(latent_num, 16)        # padded channel width (bf16 sublane tile)
    s3 = _pad_to(c3, 8)                 # per-row segment for decoder_fc columns
    og1, ob1 = 0 * cp, 1 * cp
    og2, ob2 = 2 * cp, 3 * cp
    og3, ob3 = 4 * cp, 5 * cp
    owfc = 6 * cp                       # 3 segments of s3 rows (decoder_fc rows)
    obfc = owfc + 3 * s3                # 8 rows (3 real): decoder_fc bias
    ow4 = obfc + 8                      # 3 segments of 8 rows (conv4 rows)
    ob4 = ow4 + 3 * 8                   # 8 rows (3 real): conv4 bias
    tot = ob4 + 8
    offs = (og1, ob1, og2, ob2, og3, ob3, owfc, obfc, ow4, ob4)
    return cp, c2, c3, s3, offs, tot


def pack_vae_decoder_params(p):
    """One-time parameter packing (hoisted out of the per-forward path).

    Returns:
      wpk: (3*CP, CP) bf16 — conv1/conv2/conv3 weights, each zero-padded to a
           uniform (CP, CP) block (bf16 = MXU operand dtype).
      ppk: (TOT, 1) f32 — BN gamma/beta columns plus the rows of decoder_fc /
           conv4 and their biases, as 8-row-aligned column segments.

    conv1..conv3 biases are intentionally dropped: under the module's default
    train()-mode BatchNorm (batch statistics) a pre-BN per-channel constant is
    exactly cancelled.
    """
    latent_num = p["w1"].shape[1]
    cp, _, c3, s3, _, tot = _layout(latent_num)

    def block(w):
        buf = jnp.zeros((cp, cp), jnp.float32)
        return buf.at[:w.shape[0], :w.shape[1]].set(w.astype(jnp.float32))

    wpk = jnp.concatenate(
        [block(p["w1"]), block(p["w2"]), block(p["w3"])], axis=0
    ).astype(jnp.bfloat16)

    def col(v, rows):
        v = jnp.asarray(v, jnp.float32).reshape(-1, 1)
        return jnp.pad(v, ((0, rows - v.shape[0]), (0, 0)))

    segs = [col(p["g1"], cp), col(p["be1"], cp),
            col(p["g2"], cp), col(p["be2"], cp),
            col(p["g3"], cp), col(p["be3"], cp)]
    segs += [col(p["wfc"][j], s3) for j in range(3)]
    segs += [col(p["bfc"], 8)]
    segs += [col(p["w4"][j], 8) for j in range(3)]
    segs += [col(p["b4"], 8)]
    ppk = jnp.concatenate(segs, axis=0)
    assert ppk.shape == (tot, 1)
    return wpk, ppk


def _make_kernel(*, B, L, C0, CP, c3, s3, offs):
    R = B * L
    inv_r = 1.0 / float(R)
    og1, ob1, og2, ob2, og3, ob3, owfc, obfc, ow4, ob4 = offs

    def kernel(x_ref, w_ref, p_ref, out_ref, xs_ref, po_ref):
        # ---- (1) assemble the (CP, R) activation slab in VMEM scratch:
        #      channels on sublanes, positions (b, l) lane-dense.
        for b in range(B):
            xs_ref[0:C0, b * L:(b + 1) * L] = x_ref[b]
        if CP > C0:
            xs_ref[C0:CP, :] = jnp.zeros((CP - C0, R), jnp.float32)
        h = xs_ref[...]                                         # (CP, R) f32

        def bn_relu(h, g_off, b_off):
            # train-mode BatchNorm1d over positions (lane axis), biased var,
            # single pass; normalization folded into one FMA per element.
            gamma = p_ref[g_off:g_off + CP, :]                  # (CP, 1)
            beta = p_ref[b_off:b_off + CP, :]
            s = jnp.sum(h, axis=1, keepdims=True)
            ss = jnp.sum(h * h, axis=1, keepdims=True)
            mean = s * inv_r
            var = jnp.maximum(ss * inv_r - mean * mean, 0.0)    # clamp cancellation
            scale = gamma * jax.lax.rsqrt(var + BN_EPS)
            shift = beta - mean * scale
            return jnp.maximum(h * scale + shift, 0.0)

        def conv(h, row0):
            # kernel_size=1 Conv1d == channel matmul; bf16 operands on the MXU,
            # f32 accumulation (BN re-normalizes, so bf16 operands are benign).
            w = w_ref[row0:row0 + CP, :]                        # (CP, CP) bf16
            return jnp.dot(w, h.astype(jnp.bfloat16),
                           preferred_element_type=jnp.float32)  # (CP, R) f32

        # conv1/2/3 (+ BN + ReLU); conv biases cancelled by train-mode BN.
        h = bn_relu(conv(h, 0 * CP), og1, ob1)
        h = bn_relu(conv(h, 1 * CP), og2, ob2)
        h = bn_relu(conv(h, 2 * CP), og3, ob3)

        # ---- decoder_fc (3 x c3) on the VPU/XLU: per output row, one
        #      (c3,1)-column broadcast-multiply + sublane reduction (keeps the
        #      two tiny matmuls off the serial MXU latency chain).
        h3 = h[0:c3, :]                                         # (c3, R) f32
        for j in range(3):
            wcol = p_ref[owfc + j * s3: owfc + j * s3 + c3, :]  # (c3, 1)
            po_ref[j:j + 1, :] = jnp.sum(wcol * h3, axis=0, keepdims=True)
        pts = jnp.tanh(po_ref[0:3, :] + p_ref[obfc:obfc + 3, :])   # (3, R)

        # ---- conv4 (3 x 3) on the VPU, same trick (po_ref rows reused; the
        #      pts value above is materialized before these overwrites).
        for j in range(3):
            wcol = p_ref[ow4 + j * 8: ow4 + j * 8 + 3, :]       # (3, 1)
            po_ref[j:j + 1, :] = (jnp.sum(wcol * pts, axis=0, keepdims=True)
                                  + p_ref[ob4 + j:ob4 + j + 1, :])

        # ---- (2) store directly in module layout (B, 3, L): no wrapper transpose.
        for b in range(B):
            out_ref[b, :, :] = po_ref[0:3, b * L:(b + 1) * L]

    return kernel


@jax.jit
def vae_decoder_forward(latent_code, wpk, ppk):
    """Fused VAEdecoder forward: (B, C0, L) f32 -> (B, 3, L) f32."""
    B, C0, L = latent_code.shape
    cp, _, c3, s3, offs, tot = _layout(C0)
    assert wpk.shape == (3 * cp, cp) and wpk.dtype == jnp.bfloat16
    assert ppk.shape == (tot, 1)

    kernel = _make_kernel(B=B, L=L, C0=C0, CP=cp, c3=c3, s3=s3, offs=offs)
    vmem = pl.BlockSpec(memory_space=pltpu.MemorySpace.VMEM)
    return pl.pallas_call(
        kernel,
        out_shape=jax.ShapeDtypeStruct((B, 3, L), jnp.float32),
        in_specs=[vmem, vmem, vmem],
        out_specs=vmem,
        scratch_shapes=[pltpu.VMEM((cp, B * L), jnp.float32),   # activation slab
                        pltpu.VMEM((8, B * L), jnp.float32)],   # pts / out rows
    )(latent_code, wpk, ppk)


def init_params(key, latent_num):
    """Deterministic synthetic parameters matching the PyTorch module shapes.

    Conv1d(kernel_size=1) weights stored in PyTorch orientation
    (out_channels, in_channels); biases / BN affine params as (C,) vectors.
    """
    c1 = latent_num
    c2 = latent_num // 2
    c3 = latent_num // 4
    keys = jax.random.split(key, 16)
    kit = iter(keys)

    def w(cout, cin):
        return (jax.random.normal(next(kit), (cout, cin), jnp.float32)
                * (1.0 / jnp.sqrt(cin)))

    def vec(c, scale=0.05):
        return jax.random.normal(next(kit), (c,), jnp.float32) * scale

    return {
        "w1": w(c1, latent_num), "b1": vec(c1), "g1": 1.0 + vec(c1), "be1": vec(c1),
        "w2": w(c2, c1), "b2": vec(c2), "g2": 1.0 + vec(c2), "be2": vec(c2),
        "w3": w(c3, c2), "b3": vec(c3), "g3": 1.0 + vec(c3), "be3": vec(c3),
        "wfc": w(3, c3), "bfc": vec(3),
        "w4": w(3, 3), "b4": vec(3),
    }


def reference_forward(latent_code, p, conv_dtype=jnp.float32):
    """Pure-JAX reference with the module's train-mode forward semantics.

    conv_dtype=jnp.bfloat16 mirrors the kernel's deliberate bf16-MXU-operand
    choice for conv1..conv3 (decoder_fc / conv4 stay f32 in both), isolating
    that precision choice from any structural error.  Includes the conv1/2/3
    biases and two-pass BN statistics, so it also validates the
    bias-cancellation and single-pass-variance rewrites.
    """
    B, C0, L = latent_code.shape
    x = jnp.transpose(latent_code, (0, 2, 1)).reshape(B * L, C0)
    hi = jax.lax.Precision.HIGHEST
    prec = hi if conv_dtype == jnp.float32 else None

    def conv(h, w, b):
        return jnp.dot(h.astype(conv_dtype), w.T.astype(conv_dtype),
                       preferred_element_type=jnp.float32, precision=prec) + b

    def bn_relu(h, g, be):
        m = jnp.mean(h, axis=0, keepdims=True)
        v = jnp.mean((h - m) ** 2, axis=0, keepdims=True)
        return jnp.maximum((h - m) / jnp.sqrt(v + BN_EPS) * g + be, 0.0)

    h = bn_relu(conv(x, p["w1"], p["b1"]), p["g1"], p["be1"])
    h = bn_relu(conv(h, p["w2"], p["b2"]), p["g2"], p["be2"])
    h = bn_relu(conv(h, p["w3"], p["b3"]), p["g3"], p["be3"])
    pts = jnp.tanh(jnp.dot(h, p["wfc"].T, precision=hi) + p["bfc"])
    out = jnp.dot(pts, p["w4"].T, precision=hi) + p["b4"]
    return jnp.transpose(out.reshape(B, L, 3), (0, 2, 1))


if __name__ == "__main__":
    key = jax.random.PRNGKey(0)
    k_in, k_par = jax.random.split(key)

    B, latent_num, L = 2, 32, 64          # small shapes consistent with the module
    latent_code = jax.random.normal(k_in, (B, latent_num, L), jnp.float32)
    params = init_params(k_par, latent_num)

    # One-time packing, hoisted out of the hot path (perf review item #2).
    wpk, ppk = pack_vae_decoder_params(params)

    out = jax.block_until_ready(vae_decoder_forward(latent_code, wpk, ppk))
    assert out.shape == (B, 3, L)

    # Tight structural check: same math as the kernel (bf16 conv operands,
    # f32 accumulation / BN / tanh / epilogue), differences limited to
    # accumulation order.
    ref_bf16 = jax.block_until_ready(
        reference_forward(latent_code, params, conv_dtype=jnp.bfloat16))
    assert jnp.allclose(out, ref_bf16, atol=1e-3, rtol=1e-3), \
        "mismatch vs bf16-operand reference"

    # Loose check vs the exact f32 module semantics; the slack covers only the
    # deliberate bf16 MXU-operand choice for conv1..conv3.
    ref_f32 = jax.block_until_ready(reference_forward(latent_code, params))
    assert jnp.allclose(out, ref_f32, atol=5e-2, rtol=5e-2), \
        "mismatch vs f32 reference"

    print("KERNEL_OK")
</pallas_src>

<mosaic_0001>
module attributes {stable_mosaic.version = 11 : i64} {
  func.func @kernel(%arg0: memref<2x32x64xf32, #tpu.memory_space<vmem>>, %arg1: memref<96x32xbf16, #tpu.memory_space<vmem>>, %arg2: memref<256x1xf32, #tpu.memory_space<vmem>>, %arg3: memref<2x3x64xf32, #tpu.memory_space<vmem>>, %arg4: memref<32x128xf32, #tpu.memory_space<vmem>>, %arg5: memref<8x128xf32, #tpu.memory_space<vmem>>) attributes {dimension_semantics = [], scalar_prefetch = 0 : i64, scratch_operands = 2 : i64, tpu.core_type = #tpu.core_type<tc>} {
    %c0 = arith.constant 0 : index
    %c0_0 = arith.constant 0 : index
    %c0_1 = arith.constant 0 : index
    %0 = vector.load %arg0[%c0, %c0_0, %c0_1] : memref<2x32x64xf32, #tpu.memory_space<vmem>>, vector<1x32x64xf32>
    %1 = vector.shape_cast %0 : vector<1x32x64xf32> to vector<32x64xf32>
    %c0_2 = arith.constant 0 : index
    %c0_3 = arith.constant 0 : index
    %2 = vector.load %arg4[%c0_2, %c0_3] : memref<32x128xf32, #tpu.memory_space<vmem>>, vector<32x64xf32>
    tpu.vector_store %arg4[%c0_2, %c0_3], %1 {strides = array<i32>} : memref<32x128xf32, #tpu.memory_space<vmem>>, vector<32x64xf32>,
    %c1 = arith.constant 1 : index
    %c0_4 = arith.constant 0 : index
    %c0_5 = arith.constant 0 : index
    %3 = vector.load %arg0[%c1, %c0_4, %c0_5] : memref<2x32x64xf32, #tpu.memory_space<vmem>>, vector<1x32x64xf32>
    %4 = vector.shape_cast %3 : vector<1x32x64xf32> to vector<32x64xf32>
    %c0_6 = arith.constant 0 : index
    %c64 = arith.constant 64 : index
    %5 = vector.load %arg4[%c0_6, %c64] : memref<32x128xf32, #tpu.memory_space<vmem>>, vector<32x64xf32>
    tpu.vector_store %arg4[%c0_6, %c64], %4 {strides = array<i32>} : memref<32x128xf32, #tpu.memory_space<vmem>>, vector<32x64xf32>,
    %c0_7 = arith.constant 0 : index
    %c0_8 = arith.constant 0 : index
    %6 = vector.load %arg4[%c0_7, %c0_8] : memref<32x128xf32, #tpu.memory_space<vmem>>, vector<32x128xf32>
    %c0_9 = arith.constant 0 : index
    %c0_10 = arith.constant 0 : index
    %7 = vector.load %arg1[%c0_9, %c0_10] : memref<96x32xbf16, #tpu.memory_space<vmem>>, vector<32x32xbf16>
    %8 = arith.truncf %6 : vector<32x128xf32> to vector<32x128xbf16>
    %cst = arith.constant dense<0.000000e+00> : vector<32x128xf32>
    %9 = tpu.matmul %7, %8, %cst {dimension_numbers = #tpu.dot_dimension_numbers<[1], [0], [0], [1], [0, 0, 1, 1], [], []>} : vector<32x32xbf16>, vector<32x128xbf16>, vector<32x128xf32> -> vector<32x128xf32>
    %c0_11 = arith.constant 0 : index
    %c0_12 = arith.constant 0 : index
    %10 = vector.load %arg2[%c0_11, %c0_12] : memref<256x1xf32, #tpu.memory_space<vmem>>, vector<32x1xf32>
    %c32 = arith.constant 32 : index
    %c0_13 = arith.constant 0 : index
    %11 = vector.load %arg2[%c32, %c0_13] : memref<256x1xf32, #tpu.memory_space<vmem>>, vector<32x1xf32>
    %cst_14 = arith.constant dense<0.000000e+00> : vector<32xf32>
    %12 = vector.multi_reduction <add>, %9, %cst_14 [1] : vector<32x128xf32> to vector<32xf32>
    %13 = vector.shape_cast %12 : vector<32xf32> to vector<32x1xf32>
    %14 = arith.mulf %9, %9 : vector<32x128xf32>
    %cst_15 = arith.constant dense<0.000000e+00> : vector<32xf32>
    %15 = vector.multi_reduction <add>, %14, %cst_15 [1] : vector<32x128xf32> to vector<32xf32>
    %16 = vector.shape_cast %15 : vector<32xf32> to vector<32x1xf32>
    %cst_16 = arith.constant 7.812500e-03 : f32
    %17 = vector.broadcast %cst_16 : f32 to vector<32x1xf32>
    %18 = arith.mulf %13, %17 : vector<32x1xf32>
    %cst_17 = arith.constant 7.812500e-03 : f32
    %19 = vector.broadcast %cst_17 : f32 to vector<32x1xf32>
    %20 = arith.mulf %16, %19 : vector<32x1xf32>
    %21 = arith.mulf %18, %18 : vector<32x1xf32>
    %22 = arith.subf %20, %21 : vector<32x1xf32>
    %cst_18 = arith.constant 0.000000e+00 : f32
    %23 = vector.broadcast %cst_18 : f32 to vector<32x1xf32>
    %24 = arith.maximumf %22, %23 : vector<32x1xf32>
    %cst_19 = arith.constant 9.99999974E-6 : f32
    %25 = vector.broadcast %cst_19 : f32 to vector<32x1xf32>
    %26 = arith.addf %24, %25 : vector<32x1xf32>
    %27 = math.rsqrt %26 : vector<32x1xf32>
    %28 = arith.mulf %10, %27 : vector<32x1xf32>
    %29 = arith.mulf %18, %28 : vector<32x1xf32>
    %30 = arith.subf %11, %29 : vector<32x1xf32>
    %31 = vector.broadcast %28 : vector<32x1xf32> to vector<32x128xf32>
    %32 = arith.mulf %9, %31 : vector<32x128xf32>
    %33 = vector.broadcast %30 : vector<32x1xf32> to vector<32x128xf32>
    %34 = arith.addf %32, %33 : vector<32x128xf32>
    %cst_20 = arith.constant 0.000000e+00 : f32
    %35 = vector.broadcast %cst_20 : f32 to vector<32x128xf32>
    %36 = arith.maximumf %34, %35 : vector<32x128xf32>
    %c32_21 = arith.constant 32 : index
    %c0_22 = arith.constant 0 : index
    %37 = vector.load %arg1[%c32_21, %c0_22] : memref<96x32xbf16, #tpu.memory_space<vmem>>, vector<32x32xbf16>
    %38 = arith.truncf %36 : vector<32x128xf32> to vector<32x128xbf16>
    %cst_23 = arith.constant dense<0.000000e+00> : vector<32x128xf32>
    %39 = tpu.matmul %37, %38, %cst_23 {dimension_numbers = #tpu.dot_dimension_numbers<[1], [0], [0], [1], [0, 0, 1, 1], [], []>} : vector<32x32xbf16>, vector<32x128xbf16>, vector<32x128xf32> -> vector<32x128xf32>
    %c64_24 = arith.constant 64 : index
    %c0_25 = arith.constant 0 : index
    %40 = vector.load %arg2[%c64_24, %c0_25] : memref<256x1xf32, #tpu.memory_space<vmem>>, vector<32x1xf32>
    %c96 = arith.constant 96 : index
    %c0_26 = arith.constant 0 : index
    %41 = vector.load %arg2[%c96, %c0_26] : memref<256x1xf32, #tpu.memory_space<vmem>>, vector<32x1xf32>
    %cst_27 = arith.constant dense<0.000000e+00> : vector<32xf32>
    %42 = vector.multi_reduction <add>, %39, %cst_27 [1] : vector<32x128xf32> to vector<32xf32>
    %43 = vector.shape_cast %42 : vector<32xf32> to vector<32x1xf32>
    %44 = arith.mulf %39, %39 : vector<32x128xf32>
    %cst_28 = arith.constant dense<0.000000e+00> : vector<32xf32>
    %45 = vector.multi_reduction <add>, %44, %cst_28 [1] : vector<32x128xf32> to vector<32xf32>
    %46 = vector.shape_cast %45 : vector<32xf32> to vector<32x1xf32>
    %cst_29 = arith.constant 7.812500e-03 : f32
    %47 = vector.broadcast %cst_29 : f32 to vector<32x1xf32>
    %48 = arith.mulf %43, %47 : vector<32x1xf32>
    %cst_30 = arith.constant 7.812500e-03 : f32
    %49 = vector.broadcast %cst_30 : f32 to vector<32x1xf32>
    %50 = arith.mulf %46, %49 : vector<32x1xf32>
    %51 = arith.mulf %48, %48 : vector<32x1xf32>
    %52 = arith.subf %50, %51 : vector<32x1xf32>
    %cst_31 = arith.constant 0.000000e+00 : f32
    %53 = vector.broadcast %cst_31 : f32 to vector<32x1xf32>
    %54 = arith.maximumf %52, %53 : vector<32x1xf32>
    %cst_32 = arith.constant 9.99999974E-6 : f32
    %55 = vector.broadcast %cst_32 : f32 to vector<32x1xf32>
    %56 = arith.addf %54, %55 : vector<32x1xf32>
    %57 = math.rsqrt %56 : vector<32x1xf32>
    %58 = arith.mulf %40, %57 : vector<32x1xf32>
    %59 = arith.mulf %48, %58 : vector<32x1xf32>
    %60 = arith.subf %41, %59 : vector<32x1xf32>
    %61 = vector.broadcast %58 : vector<32x1xf32> to vector<32x128xf32>
    %62 = arith.mulf %39, %61 : vector<32x128xf32>
    %63 = vector.broadcast %60 : vector<32x1xf32> to vector<32x128xf32>
    %64 = arith.addf %62, %63 : vector<32x128xf32>
    %cst_33 = arith.constant 0.000000e+00 : f32
    %65 = vector.broadcast %cst_33 : f32 to vector<32x128xf32>
    %66 = arith.maximumf %64, %65 : vector<32x128xf32>
    %c64_34 = arith.constant 64 : index
    %c0_35 = arith.constant 0 : index
    %67 = vector.load %arg1[%c64_34, %c0_35] : memref<96x32xbf16, #tpu.memory_space<vmem>>, vector<32x32xbf16>
    %68 = arith.truncf %66 : vector<32x128xf32> to vector<32x128xbf16>
    %cst_36 = arith.constant dense<0.000000e+00> : vector<32x128xf32>
    %69 = tpu.matmul %67, %68, %cst_36 {dimension_numbers = #tpu.dot_dimension_numbers<[1], [0], [0], [1], [0, 0, 1, 1], [], []>} : vector<32x32xbf16>, vector<32x128xbf16>, vector<32x128xf32> -> vector<32x128xf32>
    %c128 = arith.constant 128 : index
    %c0_37 = arith.constant 0 : index
    %70 = vector.load %arg2[%c128, %c0_37] : memref<256x1xf32, #tpu.memory_space<vmem>>, vector<32x1xf32>
    %c160 = arith.constant 160 : index
    %c0_38 = arith.constant 0 : index
    %71 = vector.load %arg2[%c160, %c0_38] : memref<256x1xf32, #tpu.memory_space<vmem>>, vector<32x1xf32>
    %cst_39 = arith.constant dense<0.000000e+00> : vector<32xf32>
    %72 = vector.multi_reduction <add>, %69, %cst_39 [1] : vector<32x128xf32> to vector<32xf32>
    %73 = vector.shape_cast %72 : vector<32xf32> to vector<32x1xf32>
    %74 = arith.mulf %69, %69 : vector<32x128xf32>
    %cst_40 = arith.constant dense<0.000000e+00> : vector<32xf32>
    %75 = vector.multi_reduction <add>, %74, %cst_40 [1] : vector<32x128xf32> to vector<32xf32>
    %76 = vector.shape_cast %75 : vector<32xf32> to vector<32x1xf32>
    %cst_41 = arith.constant 7.812500e-03 : f32
    %77 = vector.broadcast %cst_41 : f32 to vector<32x1xf32>
    %78 = arith.mulf %73, %77 : vector<32x1xf32>
    %cst_42 = arith.constant 7.812500e-03 : f32
    %79 = vector.broadcast %cst_42 : f32 to vector<32x1xf32>
    %80 = arith.mulf %76, %79 : vector<32x1xf32>
    %81 = arith.mulf %78, %78 : vector<32x1xf32>
    %82 = arith.subf %80, %81 : vector<32x1xf32>
    %cst_43 = arith.constant 0.000000e+00 : f32
    %83 = vector.broadcast %cst_43 : f32 to vector<32x1xf32>
    %84 = arith.maximumf %82, %83 : vector<32x1xf32>
    %cst_44 = arith.constant 9.99999974E-6 : f32
    %85 = vector.broadcast %cst_44 : f32 to vector<32x1xf32>
    %86 = arith.addf %84, %85 : vector<32x1xf32>
    %87 = math.rsqrt %86 : vector<32x1xf32>
    %88 = arith.mulf %70, %87 : vector<32x1xf32>
    %89 = arith.mulf %78, %88 : vector<32x1xf32>
    %90 = arith.subf %71, %89 : vector<32x1xf32>
    %91 = vector.broadcast %88 : vector<32x1xf32> to vector<32x128xf32>
    %92 = arith.mulf %69, %91 : vector<32x128xf32>
    %93 = vector.broadcast %90 : vector<32x1xf32> to vector<32x128xf32>
    %94 = arith.addf %92, %93 : vector<32x128xf32>
    %cst_45 = arith.constant 0.000000e+00 : f32
    %95 = vector.broadcast %cst_45 : f32 to vector<32x128xf32>
    %96 = arith.maximumf %94, %95 : vector<32x128xf32>
    %97 = vector.extract_strided_slice %96 {offsets = [0, 0], sizes = [8, 128], strides = [1, 1]} : vector<32x128xf32> to vector<8x128xf32>
    %c192 = arith.constant 192 : index
    %c0_46 = arith.constant 0 : index
    %98 = vector.load %arg2[%c192, %c0_46] : memref<256x1xf32, #tpu.memory_space<vmem>>, vector<8x1xf32>
    %99 = vector.broadcast %98 : vector<8x1xf32> to vector<8x128xf32>
    %100 = arith.mulf %99, %97 : vector<8x128xf32>
    %cst_47 = arith.constant dense<0.000000e+00> : vector<128xf32>
    %101 = vector.multi_reduction <add>, %100, %cst_47 [0] : vector<8x128xf32> to vector<128xf32>
    %102 = vector.shape_cast %101 : vector<128xf32> to vector<1x128xf32>
    %c0_48 = arith.constant 0 : index
    %c0_49 = arith.constant 0 : index
    %103 = vector.load %arg5[%c0_48, %c0_49] : memref<8x128xf32, #tpu.memory_space<vmem>>, vector<1x128xf32>
    tpu.vector_store %arg5[%c0_48, %c0_49], %102 {strides = array<i32>} : memref<8x128xf32, #tpu.memory_space<vmem>>, vector<1x128xf32>,
    %c200 = arith.constant 200 : index
    %c0_50 = arith.constant 0 : index
    %104 = vector.load %arg2[%c200, %c0_50] : memref<256x1xf32, #tpu.memory_space<vmem>>, vector<8x1xf32>
    %105 = vector.broadcast %104 : vector<8x1xf32> to vector<8x128xf32>
    %106 = arith.mulf %105, %97 : vector<8x128xf32>
    %cst_51 = arith.constant dense<0.000000e+00> : vector<128xf32>
    %107 = vector.multi_reduction <add>, %106, %cst_51 [0] : vector<8x128xf32> to vector<128xf32>
    %108 = vector.shape_cast %107 : vector<128xf32> to vector<1x128xf32>
    %c1_52 = arith.constant 1 : index
    %c0_53 = arith.constant 0 : index
    %109 = vector.load %arg5[%c1_52, %c0_53] : memref<8x128xf32, #tpu.memory_space<vmem>>, vector<1x128xf32>
    tpu.vector_store %arg5[%c1_52, %c0_53], %108 {strides = array<i32>} : memref<8x128xf32, #tpu.memory_space<vmem>>, vector<1x128xf32>,
    %c208 = arith.constant 208 : index
    %c0_54 = arith.constant 0 : index
    %110 = vector.load %arg2[%c208, %c0_54] : memref<256x1xf32, #tpu.memory_space<vmem>>, vector<8x1xf32>
    %111 = vector.broadcast %110 : vector<8x1xf32> to vector<8x128xf32>
    %112 = arith.mulf %111, %97 : vector<8x128xf32>
    %cst_55 = arith.constant dense<0.000000e+00> : vector<128xf32>
    %113 = vector.multi_reduction <add>, %112, %cst_55 [0] : vector<8x128xf32> to vector<128xf32>
    %114 = vector.shape_cast %113 : vector<128xf32> to vector<1x128xf32>
    %c2 = arith.constant 2 : index
    %c0_56 = arith.constant 0 : index
    %115 = vector.load %arg5[%c2, %c0_56] : memref<8x128xf32, #tpu.memory_space<vmem>>, vector<1x128xf32>
    tpu.vector_store %arg5[%c2, %c0_56], %114 {strides = array<i32>} : memref<8x128xf32, #tpu.memory_space<vmem>>, vector<1x128xf32>,
    %c0_57 = arith.constant 0 : index
    %c0_58 = arith.constant 0 : index
    %116 = vector.load %arg5[%c0_57, %c0_58] : memref<8x128xf32, #tpu.memory_space<vmem>>, vector<3x128xf32>
    %c216 = arith.constant 216 : index
    %c0_59 = arith.constant 0 : index
    %117 = vector.load %arg2[%c216, %c0_59] : memref<256x1xf32, #tpu.memory_space<vmem>>, vector<3x1xf32>
    %118 = vector.broadcast %117 : vector<3x1xf32> to vector<3x128xf32>
    %119 = arith.addf %116, %118 : vector<3x128xf32>
    %120 = math.tanh %119 : vector<3x128xf32>
    %c224 = arith.constant 224 : index
    %c0_60 = arith.constant 0 : index
    %121 = vector.load %arg2[%c224, %c0_60] : memref<256x1xf32, #tpu.memory_space<vmem>>, vector<3x1xf32>
    %122 = vector.broadcast %121 : vector<3x1xf32> to vector<3x128xf32>
    %123 = arith.mulf %122, %120 : vector<3x128xf32>
    %cst_61 = arith.constant dense<0.000000e+00> : vector<128xf32>
    %124 = vector.multi_reduction <add>, %123, %cst_61 [0] : vector<3x128xf32> to vector<128xf32>
    %125 = vector.shape_cast %124 : vector<128xf32> to vector<1x128xf32>
    %c248 = arith.constant 248 : index
    %c0_62 = arith.constant 0 : index
    %126 = vector.load %arg2[%c248, %c0_62] : memref<256x1xf32, #tpu.memory_space<vmem>>, vector<1x1xf32>
    %127 = vector.broadcast %126 : vector<1x1xf32> to vector<1x128xf32>
    %128 = arith.addf %125, %127 : vector<1x128xf32>
    %c0_63 = arith.constant 0 : index
    %c0_64 = arith.constant 0 : index
    %129 = vector.load %arg5[%c0_63, %c0_64] : memref<8x128xf32, #tpu.memory_space<vmem>>, vector<1x128xf32>
    tpu.vector_store %arg5[%c0_63, %c0_64], %128 {strides = array<i32>} : memref<8x128xf32, #tpu.memory_space<vmem>>, vector<1x128xf32>,
    %c232 = arith.constant 232 : index
    %c0_65 = arith.constant 0 : index
    %130 = vector.load %arg2[%c232, %c0_65] : memref<256x1xf32, #tpu.memory_space<vmem>>, vector<3x1xf32>
    %131 = vector.broadcast %130 : vector<3x1xf32> to vector<3x128xf32>
    %132 = arith.mulf %131, %120 : vector<3x128xf32>
    %cst_66 = arith.constant dense<0.000000e+00> : vector<128xf32>
    %133 = vector.multi_reduction <add>, %132, %cst_66 [0] : vector<3x128xf32> to vector<128xf32>
    %134 = vector.shape_cast %133 : vector<128xf32> to vector<1x128xf32>
    %c249 = arith.constant 249 : index
    %c0_67 = arith.constant 0 : index
    %135 = vector.load %arg2[%c249, %c0_67] : memref<256x1xf32, #tpu.memory_space<vmem>>, vector<1x1xf32>
    %136 = vector.broadcast %135 : vector<1x1xf32> to vector<1x128xf32>
    %137 = arith.addf %134, %136 : vector<1x128xf32>
    %c1_68 = arith.constant 1 : index
    %c0_69 = arith.constant 0 : index
    %138 = vector.load %arg5[%c1_68, %c0_69] : memref<8x128xf32, #tpu.memory_space<vmem>>, vector<1x128xf32>
    tpu.vector_store %arg5[%c1_68, %c0_69], %137 {strides = array<i32>} : memref<8x128xf32, #tpu.memory_space<vmem>>, vector<1x128xf32>,
    %c240 = arith.constant 240 : index
    %c0_70 = arith.constant 0 : index
    %139 = vector.load %arg2[%c240, %c0_70] : memref<256x1xf32, #tpu.memory_space<vmem>>, vector<3x1xf32>
    %140 = vector.broadcast %139 : vector<3x1xf32> to vector<3x128xf32>
    %141 = arith.mulf %140, %120 : vector<3x128xf32>
    %cst_71 = arith.constant dense<0.000000e+00> : vector<128xf32>
    %142 = vector.multi_reduction <add>, %141, %cst_71 [0] : vector<3x128xf32> to vector<128xf32>
    %143 = vector.shape_cast %142 : vector<128xf32> to vector<1x128xf32>
    %c250 = arith.constant 250 : index
    %c0_72 = arith.constant 0 : index
    %144 = vector.load %arg2[%c250, %c0_72] : memref<256x1xf32, #tpu.memory_space<vmem>>, vector<1x1xf32>
    %145 = vector.broadcast %144 : vector<1x1xf32> to vector<1x128xf32>
    %146 = arith.addf %143, %145 : vector<1x128xf32>
    %c2_73 = arith.constant 2 : index
    %c0_74 = arith.constant 0 : index
    %147 = vector.load %arg5[%c2_73, %c0_74] : memref<8x128xf32, #tpu.memory_space<vmem>>, vector<1x128xf32>
    tpu.vector_store %arg5[%c2_73, %c0_74], %146 {strides = array<i32>} : memref<8x128xf32, #tpu.memory_space<vmem>>, vector<1x128xf32>,
    %c0_75 = arith.constant 0 : index
    %c0_76 = arith.constant 0 : index
    %148 = vector.load %arg5[%c0_75, %c0_76] : memref<8x128xf32, #tpu.memory_space<vmem>>, vector<3x64xf32>
    %c0_77 = arith.constant 0 : index
    %c0_78 = arith.constant 0 : index
    %c0_79 = arith.constant 0 : index
    %149 = vector.load %arg3[%c0_77, %c0_78, %c0_79] : memref<2x3x64xf32, #tpu.memory_space<vmem>>, vector<1x3x64xf32>
    %150 = vector.shape_cast %149 : vector<1x3x64xf32> to vector<3x64xf32>
    %151 = vector.shape_cast %148 : vector<3x64xf32> to vector<1x3x64xf32>
    tpu.vector_store %arg3[%c0_77, %c0_78, %c0_79], %151 {strides = array<i32>} : memref<2x3x64xf32, #tpu.memory_space<vmem>>, vector<1x3x64xf32>,
    %c0_80 = arith.constant 0 : index
    %c64_81 = arith.constant 64 : index
    %152 = vector.load %arg5[%c0_80, %c64_81] : memref<8x128xf32, #tpu.memory_space<vmem>>, vector<3x64xf32>
    %c1_82 = arith.constant 1 : index
    %c0_83 = arith.constant 0 : index
    %c0_84 = arith.constant 0 : index
    %153 = vector.load %arg3[%c1_82, %c0_83, %c0_84] : memref<2x3x64xf32, #tpu.memory_space<vmem>>, vector<1x3x64xf32>
    %154 = vector.shape_cast %153 : vector<1x3x64xf32> to vector<3x64xf32>
    %155 = vector.shape_cast %152 : vector<3x64xf32> to vector<1x3x64xf32>
    tpu.vector_store %arg3[%c1_82, %c0_83, %c0_84], %155 {strides = array<i32>} : memref<2x3x64xf32, #tpu.memory_space<vmem>>, vector<1x3x64xf32>,
    return
  }
}

</mosaic_0001>

<bundles_post_ra>
// kernel: vae_decoder_forward.1
= control target key start
LH: loop header
LB: loop body
LE: loop exit
PB: predicated region body
PF: predicated region fallthrough
CT: control target
= control target key end

     0   :  { %s726_s16 = smov 64   ;;  %vm19_vm0 = vcmask 523264   ;;  %vm45_vm1 = vcmask 1048064   ;;  %vm70_vm2 = vcmask 261120   ;;  %v727_v28 = vmov 0   ;;  %s964_s0 = inlined_call_operand.vmem [shape: f32[2,32,64], index: 0, kind: input, shape index: {}]   ;;  %s965_s1 = inlined_call_operand.vmem [shape: bf16[96,32], index: 1, kind: input, shape index: {}]   ;;  %s966_s2 = inlined_call_operand.vmem [shape: f32[256,1], index: 2, kind: input, shape index: {}]   ;;  %s967_s3 = inlined_call_operand.vmem [shape: f32[2,3,64], index: 3, kind: output, shape index: {}]  }
   0x1   :  { %v660_v0 = vld [vmem:[%s964_s0 + $0x30] sm:$0xff]  ;;  %v658_v1 = vld [vmem:[%s964_s0 + $0x20] sm:$0xff]  ;;  %v661_v2 = vld [vmem:[%s964_s0 + $0x38] sm:$0xff]  ;;  %703 = vset.pattern.permute.xlu2 %v727_v28  ;;  %705 = vset.pattern.permute.xlu1 %v727_v28 }
   0x2   :  { %37 = vrot.lane.b32.xlu0 %v660_v0, %s726_s16  ;;  %33 = vrot.lane.b32.xlu1 %v658_v1, %s726_s16  ;;  %v659_v3 = vld [vmem:[%s964_s0 + $0x28] sm:$0xff]  ;;  %v17_v4 = vld [vmem:[%s964_s0 + $0x10] sm:$0xff] }
   0x3   :  { %22 = vst.msk [vmem:[#allocation2 + $0x10] sm:$0xff] %vm19_vm0, %v17_v4  ;;  %v15_v5 = vld [vmem:[%s964_s0] sm:$0xff]  ;;  %v18_v6 = vld [vmem:[%s964_s0 + $0x18] sm:$0xff]  ;;  %v16_v7 = vld [vmem:[%s964_s0 + $0x8] sm:$0xff]  ;;  %704 = vset.pattern.permute.xlu0 %v727_v28 }
   0x4   :  { %20 = vst.msk [vmem:[#allocation2] sm:$0xff] %vm19_vm0, %v15_v5  ;;  %v694_v18 = vld [vmem:[%s965_s1 + $0x8] sm:$0xff]  ;;  %v693_v19 = vld [vmem:[%s965_s1] sm:$0xff]  ;;  %v98_v54 = vld [vmem:[%s966_s2 + $0x10] sm:$0xff] }
   0x5   :  { %23 = vst.msk [vmem:[#allocation2 + $0x18] sm:$0xff] %vm19_vm0, %v18_v6  ;;  %v102_v61 = vld [vmem:[%s966_s2 + $0x30] sm:$0xff]  ;;  %v99_v4 = vld [vmem:[%s966_s2 + $0x18] sm:$0xff] }
   0x6   :  { %21 = vst.msk [vmem:[#allocation2 + $0x8] sm:$0xff] %vm19_vm0, %v16_v7 }
   0xa   :  { %39 = vrot.lane.b32.xlu0 %v661_v2, %s726_s16  ;;  %35 = vrot.lane.b32.xlu1 %v659_v3, %s726_s16 }
  0x74   :  { %v38_v8 = vpop.permute.xlu0 %37  ;;  %v34_v9 = vpop.permute.xlu1 %33 }
  0x75   :  { %48 = vst.msk [vmem:[#allocation2 + $0x10] sm:$0xff] %vm45_vm1, %v38_v8 }
  0x76   :  { %46 = vst.msk [vmem:[#allocation2] sm:$0xff] %vm45_vm1, %v34_v9 }
  0x7c   :  { %v40_v10 = vpop.permute.xlu0 %39  ;;  %v36_v11 = vpop.permute.xlu1 %35  ;;  %v52_v12 = vld [vmem:[#allocation2 + $0x10] sm:$0xff] }
  0x7d   :  { %49 = vst.msk [vmem:[#allocation2 + $0x18] sm:$0xff] %vm45_vm1, %v40_v10  ;;  %v50_v16 = vld [vmem:[#allocation2] sm:$0xff] }
  0x7e   :  { %47 = vst.msk [vmem:[#allocation2 + $0x8] sm:$0xff] %vm45_vm1, %v36_v11 }
  0x84   :  { %v53_v13 = vld [vmem:[#allocation2 + $0x18] sm:$0xff] }
  0x85   :  { %v59_v14 = vpack.c.bf16 %v53_v13, %v52_v12  ;;  %v51_v15 = vld [vmem:[#allocation2 + $0x8] sm:$0xff] }
  0x86   :  { %v58_v17 = vpack.c.bf16 %v51_v15, %v50_v16 }
  0x87   :  { %83 = vmatpush.bf16.msra.mxu0 %v59_v14  ;;  %699 = vmatpush.bf16.msra.mxu3 %v59_v14 }
  0x8b   :  { %84 = vmatpush.bf16.msra.mxu0 %v58_v17  ;;  %700 = vmatpush.bf16.msra.mxu3 %v58_v17 }
  0x8e   :  { %671 = vmatmul.msk.bf16.vlgmr.msra.gmra.mxu3 %vm70_vm2, %v694_v18  ;;  %670 = vmatmul.msk.bf16.vlgmr.msra.gmra.mxu0 %vm70_vm2, %v693_v19 }
 0x10b   :  { %v794_v24 = vpop.f32.mrf.mxu0 }
 0x10c   :  { %v112_v26 = vmul.f32 %v794_v24, %v794_v24 }
 0x111   :  { %v784_v20 = vpop.f32.mrf.mxu3 }
 0x112   :  { %108 = vadd.xlane.f32.xlu2 %v784_v20  ;;  %v114_v21 = vmul.f32 %v784_v20, %v784_v20 }
 0x113   :  { %v797_v25 = vpop.f32.mrf.mxu0 }
 0x114   :  { %120 = vadd.xlane.f32.xlu0 %v114_v21  ;;  %v113_v27 = vmul.f32 %v797_v25, %v797_v25 }
 0x119   :  { %v789_v22 = vpop.f32.mrf.mxu3 }
 0x11a   :  { %110 = vadd.xlane.f32.xlu2 %v789_v22  ;;  %v115_v23 = vmul.f32 %v789_v22, %v789_v22 }
 0x11c   :  { %122 = vadd.xlane.f32.xlu1 %v115_v23 }
 0x122   :  { %104 = vadd.xlane.f32.xlu2 %v794_v24 }
 0x12a   :  { %106 = vadd.xlane.f32.xlu2 %v797_v25 }
 0x132   :  { %116 = vadd.xlane.f32.xlu2 %v112_v26 }
 0x13a   :  { %118 = vadd.xlane.f32.xlu2 %v113_v27 }
 0x185   :  { %v109_v29 = vpop.xlane.xlu2 %108 }
 0x186   :  { %v126_v30 = vmul.f32 0.0078125, %v109_v29  ;;  %v96_v29 = vld [vmem:[%s966_s2] sm:$0xff] }
 0x187   :  { %v121_v31 = vpop.xlane.xlu0 %120 }
 0x188   :  { %v134_v32 = vmul.f32 %v126_v30, %v126_v30  ;;  %v130_v33 = vmul.f32 0.0078125, %v121_v31 }
 0x18a   :  { %v138_v34 = vsub.f32 %v130_v33, %v134_v32 }
 0x18c   :  { %v142_v35 = vmax.f32 %v138_v34, 0.0 }
 0x18d   :  { %v111_v36 = vpop.xlane.xlu2 %110 }
 0x18e   :  { %v146_v37 = vadd.f32 1e-05, %v142_v35  ;;  %v804_v38 = vmul.f32 0.0078125, %v111_v36 }
 0x18f   :  { %v123_v39 = vpop.xlane.xlu1 %122 }
 0x190   :  { %706 = vrsqrt.f32 %v146_v37  ;;  %v135_v40 = vmul.f32 %v804_v38, %v804_v38  ;;  %v131_v41 = vmul.f32 0.0078125, %v123_v39  ;;  %vm174_vm4 = vweird.f32 %v146_v37  ;;  %v97_v39 = vld [vmem:[%s966_s2 + $0x8] sm:$0xff] }
 0x192   :  { %v139_v42 = vsub.f32 %v131_v41, %v135_v40 }
 0x194   :  { %v143_v43 = vmax.f32 %v139_v42, 0.0 }
 0x195   :  { %v105_v44 = vpop.xlane.xlu2 %104 }
 0x196   :  { %v707_v45 = vpop.eup %706  ;;  %v147_v46 = vadd.f32 1e-05, %v143_v43  ;;  %v124_v58 = vmul.f32 0.0078125, %v105_v44 }
 0x197   :  { %v169_v47 = vmul.f32 %v707_v45, %v146_v37  ;;  %vm175_vm3 = vweird.f32 %v707_v45  ;;  %v103_v37 = vld [vmem:[%s966_s2 + $0x38] sm:$0xff] }
 0x198   :  { %708 = vrsqrt.f32 %v147_v46  ;;  %vm176_vm5 = vmor %vm174_vm4, %vm175_vm3  ;;  %v132_v1 = vmul.f32 %v124_v58, %v124_v58  ;;  %vm184_vm7 = vweird.f32 %v147_v46 }
 0x199   :  { %v170_v48 = vmul.f32 %v707_v45, %v169_v47 }
 0x19b   :  { %v171_v49 = vmul.f32 0.5, %v170_v48 }
 0x19d   :  { %v172_v50 = vsub.f32 1.5, %v171_v49  ;;  %v107_v51 = vpop.xlane.xlu2 %106 }
 0x19e   :  { %v709_v52 = vpop.eup %708  ;;  %v125_v8 = vmul.f32 0.0078125, %v107_v51 }
 0x19f   :  { %v179_v53 = vmul.f32 %v709_v52, %v147_v46  ;;  %v173_v55 = vmul.f32 %v707_v45, %v172_v50  ;;  %vm185_vm6 = vweird.f32 %v709_v52  ;;  %v101_v46 = vld [vmem:[%s966_s2 + $0x28] sm:$0xff] }
 0x1a0   :  { %vm186_vm8 = vmor %vm184_vm7, %vm185_vm6  ;;  %v133_v13 = vmul.f32 %v125_v8, %v125_v8 }
 0x1a1   :  { %v180_v56 = vmul.f32 %v709_v52, %v179_v53  ;;  %v177_v57 = vsel %vm176_vm5, %v707_v45, %v173_v55 }
 0x1a2   :  { %v190_v59 = vmul.f32 %v177_v57, %v98_v54 }
 0x1a3   :  { %v181_v60 = vmul.f32 0.5, %v180_v56 }
 0x1a4   :  { %212 = vperm.xlu2 %703, %v190_v59   ;;  %v194_v62 = vmul.f32 %v190_v59, %v126_v30 }
 0x1a5   :  { %v182_v63 = vsub.f32 1.5, %v181_v60  ;;  %v117_v0 = vpop.xlane.xlu2 %116 }
 0x1a6   :  { %v128_v2 = vmul.f32 0.0078125, %v117_v0  ;;  %v198_v3 = vsub.f32 %v102_v61, %v194_v62 }
 0x1a7   :  { %v183_v5 = vmul.f32 %v709_v52, %v182_v63 }
 0x1a8   :  { %v136_v6 = vsub.f32 %v128_v2, %v132_v1  ;;  %236 = vperm.xlu1 %705, %v198_v3  }
 0x1a9   :  { %v187_v7 = vsel %vm186_vm8, %v709_v52, %v183_v5 }
 0x1aa   :  { %v140_v9 = vmax.f32 %v136_v6, 0.0  ;;  %v191_v10 = vmul.f32 %v187_v7, %v99_v4  ;;  %v696_v6 = vld [vmem:[%s965_s1 + $0x18] sm:$0xff] }
 0x1ac   :  { %v144_v11 = vadd.f32 1e-05, %v140_v9  ;;  %217 = vperm.xlu0 %704, %v191_v10   ;;  %v195_v36 = vmul.f32 %v191_v10, %v804_v38  ;;  %v100_v38 = vld [vmem:[%s966_s2 + $0x20] sm:$0xff] }
 0x1ad   :  { %v119_v12 = vpop.xlane.xlu2 %118 }
 0x1ae   :  { %710 = vrsqrt.f32 %v144_v11  ;;  %v129_v14 = vmul.f32 0.0078125, %v119_v12  ;;  %vm154_vm10 = vweird.f32 %v144_v11  ;;  %v199_v42 = vsub.f32 %v103_v37, %v195_v36 }
 0x1b0   :  { %v137_v15 = vsub.f32 %v129_v14, %v133_v13 }
 0x1b2   :  { %v141_v16 = vmax.f32 %v137_v15, 0.0 }
 0x1b4   :  { %v711_v17 = vpop.eup %710  ;;  %v145_v18 = vadd.f32 1e-05, %v141_v16 }
 0x1b5   :  { %v149_v19 = vmul.f32 %v711_v17, %v144_v11  ;;  %vm155_vm9 = vweird.f32 %v711_v17 }
 0x1b6   :  { %712 = vrsqrt.f32 %v145_v18  ;;  %vm156_vm11 = vmor %vm154_vm10, %vm155_vm9  ;;  %vm164_vm13 = vweird.f32 %v145_v18 }
 0x1b7   :  { %v150_v21 = vmul.f32 %v711_v17, %v149_v19 }
 0x1b9   :  { %v151_v23 = vmul.f32 0.5, %v150_v21 }
 0x1bb   :  { %v152_v26 = vsub.f32 1.5, %v151_v23 }
 0x1bc   :  { %v713_v27 = vpop.eup %712 }
 0x1bd   :  { %v159_v28 = vmul.f32 %v713_v27, %v145_v18  ;;  %v153_v30 = vmul.f32 %v711_v17, %v152_v26  ;;  %vm165_vm12 = vweird.f32 %v713_v27 }
 0x1be   :  { %vm166_vm14 = vmor %vm164_vm13, %vm165_vm12 }
 0x1bf   :  { %v160_v31 = vmul.f32 %v713_v27, %v159_v28  ;;  %v157_v32 = vsel %vm156_vm11, %v711_v17, %v153_v30 }
 0x1c0   :  { %v188_v33 = vmul.f32 %v157_v32, %v96_v29 }
 0x1c1   :  { %v161_v34 = vmul.f32 0.5, %v160_v31 }
 0x1c2   :  { %202 = vperm.xlu2 %703, %v188_v33   ;;  %v192_v44 = vmul.f32 %v188_v33, %v124_v58 }
 0x1c3   :  { %v162_v35 = vsub.f32 1.5, %v161_v34 }
 0x1c4   :  { %v196_v47 = vsub.f32 %v100_v38, %v192_v44 }
 0x1c5   :  { %v163_v40 = vmul.f32 %v713_v27, %v162_v35 }
 0x1c7   :  { %v167_v41 = vsel %vm166_vm14, %v713_v27, %v163_v40 }
 0x1c8   :  { %v189_v43 = vmul.f32 %v167_v41, %v97_v39 }
 0x1ca   :  { %241 = vperm.xlu2 %703, %v199_v42   ;;  %207 = vperm.xlu1 %705, %v189_v43   ;;  %v193_v45 = vmul.f32 %v189_v43, %v125_v8 }
 0x1cc   :  { %v197_v48 = vsub.f32 %v101_v46, %v193_v45 }
 0x1d2   :  { %226 = vperm.xlu2 %703, %v196_v47   ;;  %231 = vperm.xlu1 %705, %v197_v48  }
 0x1fe   :  { %v213_v49 = vpop.permute.xlu2 %212 }
 0x1ff   :  { %v222_v53 = vmul.f32 %v213_v49, %v784_v20 }
 0x21a   :  { %v237_v51 = vpop.permute.xlu1 %236 }
 0x21b   :  { %v246_v54 = vadd.f32 %v237_v51, %v222_v53 }
 0x21c   :  { %v203_v50 = vpop.permute.xlu2 %202 }
 0x21d   :  { %v250_v58 = vmax.f32 %v246_v54, 0.0  ;;  %v220_v63 = vmul.f32 %v203_v50, %v794_v24 }
 0x21e   :  { %v218_v52 = vpop.permute.xlu0 %217 }
 0x21f   :  { %v223_v55 = vmul.f32 %v218_v52, %v789_v22  ;;  %v695_v22 = vld [vmem:[%s965_s1 + $0x10] sm:$0xff] }
 0x224   :  { %v242_v56 = vpop.permute.xlu2 %241 }
 0x225   :  { %v247_v57 = vadd.f32 %v242_v56, %v223_v55  ;;  %v295_v55 = vld [vmem:[%s966_s2 + $0x50] sm:$0xff] }
 0x227   :  { %v251_v59 = vmax.f32 %v247_v57, 0.0 }
 0x229   :  { %v257_v60 = vpack.c.bf16 %v251_v59, %v250_v58 }
 0x22b   :  { %280 = vmatpush.bf16.msra.mxu1 %v257_v60 }
 0x22c   :  { %v227_v62 = vpop.permute.xlu2 %226 }
 0x22d   :  { %v244_v0 = vadd.f32 %v227_v62, %v220_v63 }
 0x22f   :  { %v248_v4 = vmax.f32 %v244_v0, 0.0 }
 0x23c   :  { %v208_v61 = vpop.permute.xlu1 %207 }
 0x23d   :  { %v221_v1 = vmul.f32 %v208_v61, %v797_v25 }
 0x244   :  { %v232_v2 = vpop.permute.xlu1 %231 }
 0x245   :  { %v245_v3 = vadd.f32 %v232_v2, %v221_v1 }
 0x247   :  { %v249_v20 = vmax.f32 %v245_v3, 0.0 }
 0x249   :  { %v256_v5 = vpack.c.bf16 %v249_v20, %v248_v4  ;;  %v296_v4 = vld [vmem:[%s966_s2 + $0x58] sm:$0xff] }
 0x24b   :  { %281 = vmatpush.bf16.msra.mxu1 %v256_v5 }
 0x24e   :  { %680 = vmatmul.msk.bf16.vlgmr.msra.gmra.mxu1 %vm70_vm2, %v695_v22 }
 0x25e   :  { %681 = vmatmul.msk.bf16.gmra.mxu1 %vm70_vm2, %v696_v6 }
 0x2cb   :  { %v845_v24 = vpop.f32.mrf.mxu1 }
 0x2cc   :  { %301 = vadd.xlane.f32.xlu0 %v845_v24  ;;  %v309_v12 = vmul.f32 %v845_v24, %v845_v24 }
 0x2d3   :  { %v848_v25 = vpop.f32.mrf.mxu1 }
 0x2d4   :  { %v310_v11 = vmul.f32 %v848_v25, %v848_v25 }
 0x2db   :  { %v850_v7 = vpop.f32.mrf.mxu1 }
 0x2dc   :  { %305 = vadd.xlane.f32.xlu2 %v850_v7  ;;  %v311_v8 = vmul.f32 %v850_v7, %v850_v7 }
 0x2de   :  { %317 = vadd.xlane.f32.xlu1 %v311_v8 }
 0x2e3   :  { %v855_v9 = vpop.f32.mrf.mxu1 }
 0x2e4   :  { %307 = vadd.xlane.f32.xlu0 %v855_v9  ;;  %v312_v10 = vmul.f32 %v855_v9, %v855_v9 }
 0x2e6   :  { %303 = vadd.xlane.f32.xlu1 %v848_v25  ;;  %319 = vadd.xlane.f32.xlu2 %v312_v10 }
 0x2ec   :  { %315 = vadd.xlane.f32.xlu0 %v310_v11 }
 0x2ee   :  { %313 = vadd.xlane.f32.xlu2 %v309_v12  ;;  %v300_v12 = vld [vmem:[%s966_s2 + $0x78] sm:$0xff] }
 0x33f   :  { %v302_v13 = vpop.xlane.xlu0 %301 }
 0x340   :  { %v875_v34 = vmul.f32 0.0078125, %v302_v13 }
 0x342   :  { %v329_v44 = vmul.f32 %v875_v34, %v875_v34 }
 0x34f   :  { %v306_v14 = vpop.xlane.xlu2 %305 }
 0x350   :  { %v865_v15 = vmul.f32 0.0078125, %v306_v14 }
 0x351   :  { %v318_v16 = vpop.xlane.xlu1 %317 }
 0x352   :  { %v331_v17 = vmul.f32 %v865_v15, %v865_v15  ;;  %v327_v18 = vmul.f32 0.0078125, %v318_v16 }
 0x354   :  { %v335_v19 = vsub.f32 %v327_v18, %v331_v17  ;;  %v293_v18 = vld [vmem:[%s966_s2 + $0x40] sm:$0xff] }
 0x356   :  { %v339_v21 = vmax.f32 %v335_v19, 0.0 }
 0x357   :  { %v308_v23 = vpop.xlane.xlu0 %307 }
 0x358   :  { %v343_v26 = vadd.f32 1e-05, %v339_v21  ;;  %v869_v27 = vmul.f32 0.0078125, %v308_v23  ;;  %v294_v21 = vld [vmem:[%s966_s2 + $0x48] sm:$0xff] }
 0x359   :  { %v304_v28 = vpop.xlane.xlu1 %303  ;;  %v320_v29 = vpop.xlane.xlu2 %319 }
 0x35a   :  { %714 = vrsqrt.f32 %v343_v26  ;;  %v332_v30 = vmul.f32 %v869_v27, %v869_v27  ;;  %v328_v31 = vmul.f32 0.0078125, %v320_v29  ;;  %v873_v32 = vmul.f32 0.0078125, %v304_v28  ;;  %v297_v29 = vld [vmem:[%s966_s2 + $0x60] sm:$0xff] }
 0x35b   :  { %vm371_vm0 = vweird.f32 %v343_v26 }
 0x35c   :  { %v336_v33 = vsub.f32 %v328_v31, %v332_v30  ;;  %v330_v39 = vmul.f32 %v873_v32, %v873_v32 }
 0x35e   :  { %v340_v35 = vmax.f32 %v336_v33, 0.0 }
 0x35f   :  { %v316_v36 = vpop.xlane.xlu0 %315 }
 0x360   :  { %v715_v37 = vpop.eup %714  ;;  %v326_v40 = vmul.f32 0.0078125, %v316_v36  ;;  %v344_v42 = vadd.f32 1e-05, %v340_v35  ;;  %v299_v35 = vld [vmem:[%s966_s2 + $0x70] sm:$0xff] }
 0x361   :  { %v366_v41 = vmul.f32 %v715_v37, %v343_v26  ;;  %v314_v43 = vpop.xlane.xlu2 %313  ;;  %vm372_vm15 = vweird.f32 %v715_v37 }
 0x362   :  { %v334_v45 = vsub.f32 %v326_v40, %v330_v39  ;;  %v325_v38 = vmul.f32 0.0078125, %v314_v43  ;;  %716 = vrsqrt.f32 %v344_v42  ;;  %vm373_vm1 = vmor %vm371_vm0, %vm372_vm15  ;;  %vm381_vm4 = vweird.f32 %v344_v42  ;;  %v298_v39 = vld [vmem:[%s966_s2 + $0x68] sm:$0xff] }
 0x363   :  { %v367_v46 = vmul.f32 %v715_v37, %v366_v41  ;;  %vm645_vm15 = vcmask 518144  }
 0x364   :  { %v338_v47 = vmax.f32 %v334_v45, 0.0  ;;  %v333_v48 = vsub.f32 %v325_v38, %v329_v44 }
 0x365   :  { %v368_v49 = vmul.f32 0.5, %v367_v46 }
 0x366   :  { %v342_v50 = vadd.f32 1e-05, %v338_v47  ;;  %v337_v51 = vmax.f32 %v333_v48, 0.0 }
 0x367   :  { %v369_v52 = vsub.f32 1.5, %v368_v49 }
 0x368   :  { %718 = vrsqrt.f32 %v342_v50  ;;  %v341_v53 = vadd.f32 1e-05, %v337_v51  ;;  %v717_v54 = vpop.eup %716  ;;  %vm361_vm8 = vweird.f32 %v342_v50 }
 0x369   :  { %v370_v56 = vmul.f32 %v715_v37, %v369_v52  ;;  %v376_v57 = vmul.f32 %v717_v54, %v344_v42  ;;  %vm382_vm3 = vweird.f32 %v717_v54 }
 0x36a   :  { %720 = vrsqrt.f32 %v341_v53  ;;  %vm383_vm5 = vmor %vm381_vm4, %vm382_vm3  ;;  %vm351_vm9 = vweird.f32 %v341_v53 }
 0x36b   :  { %v374_v58 = vsel %vm373_vm1, %v715_v37, %v370_v56  ;;  %v377_v59 = vmul.f32 %v717_v54, %v376_v57 }
 0x36c   :  { %v387_v60 = vmul.f32 %v374_v58, %v295_v55 }
 0x36d   :  { %v378_v62 = vmul.f32 0.5, %v377_v59 }
 0x36e   :  { %v719_v61 = vpop.eup %718  ;;  %409 = vperm.xlu1 %705, %v387_v60   ;;  %v391_v33 = vmul.f32 %v387_v60, %v865_v15  ;;  %v540_v15 = vld [vmem:[%s966_s2 + $0xc8] sm:$0xff] }
 0x36f   :  { %v356_v63 = vmul.f32 %v719_v61, %v342_v50  ;;  %v379_v1 = vsub.f32 1.5, %v378_v62  ;;  %vm362_vm6 = vweird.f32 %v719_v61  ;;  %v600_v62 = vld [vmem:[%s966_s2 + $0xe8] sm:$0x7] }
 0x370   :  { %v721_v0 = vpop.eup %720  ;;  %vm363_vm10 = vmor %vm361_vm8, %vm362_vm6  ;;  %v395_v36 = vsub.f32 %v299_v35, %v391_v33 }
 0x371   :  { %v357_v2 = vmul.f32 %v719_v61, %v356_v63  ;;  %v346_v3 = vmul.f32 %v721_v0, %v341_v53  ;;  %v380_v20 = vmul.f32 %v717_v54, %v379_v1  ;;  %vm352_vm7 = vweird.f32 %v721_v0  ;;  %v614_v63 = vld [vmem:[%s966_s2 + $0xf9] sm:$0x1] }
 0x372   :  { %vm353_vm11 = vmor %vm351_vm9, %vm352_vm7 }
 0x373   :  { %v358_v5 = vmul.f32 0.5, %v357_v2  ;;  %v347_v22 = vmul.f32 %v721_v0, %v346_v3  ;;  %v384_v6 = vsel %vm383_vm5, %v717_v54, %v380_v20 }
 0x374   :  { %v388_v11 = vmul.f32 %v384_v6, %v296_v4 }
 0x375   :  { %v359_v8 = vsub.f32 1.5, %v358_v5  ;;  %v348_v10 = vmul.f32 0.5, %v347_v22 }
 0x376   :  { %414 = vperm.xlu2 %703, %v388_v11   ;;  %v392_v14 = vmul.f32 %v388_v11, %v869_v27 }
 0x377   :  { %v349_v13 = vsub.f32 1.5, %v348_v10  ;;  %v360_v16 = vmul.f32 %v719_v61, %v359_v8 }
 0x378   :  { %v396_v17 = vsub.f32 %v300_v12, %v392_v14 }
 0x379   :  { %v350_v19 = vmul.f32 %v721_v0, %v349_v13  ;;  %v364_v23 = vsel %vm363_vm10, %v719_v61, %v360_v16  ;;  %v487_v13 = vld [vmem:[%s966_s2 + $0x80] sm:$0xff] }
 0x37a   :  { %438 = vperm.xlu1 %705, %v396_v17   ;;  %v386_v28 = vmul.f32 %v364_v23, %v294_v21  ;;  %v554_v23 = vld [vmem:[%s966_s2 + $0xd0] sm:$0xff] }
 0x37b   :  { %v354_v26 = vsel %vm353_vm11, %v721_v0, %v350_v19  ;;  %v488_v19 = vld [vmem:[%s966_s2 + $0xa0] sm:$0xff] }
 0x37c   :  { %v385_v27 = vmul.f32 %v354_v26, %v293_v18  ;;  %v390_v37 = vmul.f32 %v386_v28, %v873_v32  ;;  %v577_v26 = vld [vmem:[%s966_s2 + $0xe0] sm:$0x7] }
 0x37e   :  { %399 = vperm.xlu0 %704, %v385_v27   ;;  %v389_v30 = vmul.f32 %v385_v27, %v875_v34  ;;  %404 = vperm.xlu2 %703, %v386_v28   ;;  %v394_v40 = vsub.f32 %v298_v39, %v390_v37  ;;  %v526_v34 = vld [vmem:[%s966_s2 + $0xc0] sm:$0xff]  ;;  %v622_v27 = vld [vmem:[%s966_s2 + $0xf0] sm:$0x7]  ;;  %v592_v28 = vld [vmem:[%s966_s2 + $0xf8] sm:$0x1] }
 0x37f   :  { %v698_v37 = vld [vmem:[%s965_s1 + $0x28] sm:$0xff] }
 0x380   :  { %v393_v31 = vsub.f32 %v297_v29, %v389_v30  ;;  %v636_v29 = vld [vmem:[%s966_s2 + $0xfa] sm:$0x1] }
 0x382   :  { %423 = vperm.xlu1 %705, %v393_v31  }
 0x386   :  { %433 = vperm.xlu0 %704, %v395_v36  }
 0x38e   :  { %428 = vperm.xlu0 %704, %v394_v40  }
 0x396   :  { %529 = vperm.xlu0 %704, %v526_v34  }
 0x39e   :  { %543 = vperm.xlu0 %704, %v540_v15  }
 0x3d0   :  { %v415_v43 = vpop.permute.xlu2 %414 }
 0x3d1   :  { %v420_v44 = vmul.f32 %v415_v43, %v855_v9 }
 0x3d8   :  { %v405_v50 = vpop.permute.xlu2 %404 }
 0x3d9   :  { %v418_v54 = vmul.f32 %v405_v50, %v848_v25  ;;  %v569_v25 = vld [vmem:[%s966_s2 + $0xd8] sm:$0x7] }
 0x3e0   :  { %v410_v41 = vpop.permute.xlu1 %409 }
 0x3e1   :  { %v419_v45 = vmul.f32 %v410_v41, %v850_v7  ;;  %v697_v7 = vld [vmem:[%s965_s1 + $0x20] sm:$0xff] }
 0x3ec   :  { %v439_v32 = vpop.permute.xlu1 %438 }
 0x3ed   :  { %v444_v38 = vadd.f32 %v439_v32, %v420_v44 }
 0x3ef   :  { %v448_v48 = vmax.f32 %v444_v38, 0.0 }
 0x3f0   :  { %v400_v42 = vpop.permute.xlu0 %399 }
 0x3f1   :  { %v417_v52 = vmul.f32 %v400_v42, %v845_v24 }
 0x3f4   :  { %v424_v51 = vpop.permute.xlu1 %423 }
 0x3f5   :  { %v441_v55 = vadd.f32 %v424_v51, %v417_v52 }
 0x3f7   :  { %v445_v58 = vmax.f32 %v441_v55, 0.0 }
 0x3f8   :  { %v434_v46 = vpop.permute.xlu0 %433 }
 0x3f9   :  { %v443_v47 = vadd.f32 %v434_v46, %v419_v45 }
 0x3fb   :  { %v447_v49 = vmax.f32 %v443_v47, 0.0 }
 0x3fd   :  { %v454_v53 = vpack.c.bf16 %v448_v48, %v447_v49 }
 0x3ff   :  { %477 = vmatpush.bf16.msra.mxu2 %v454_v53 }
 0x400   :  { %v429_v56 = vpop.permute.xlu0 %428 }
 0x401   :  { %v442_v57 = vadd.f32 %v429_v56, %v418_v54 }
 0x403   :  { %v446_v9 = vmax.f32 %v442_v57, 0.0 }
 0x405   :  { %v453_v59 = vpack.c.bf16 %v446_v9, %v445_v58 }
 0x407   :  { %478 = vmatpush.bf16.msra.mxu2 %v453_v59 }
 0x408   :  { %v530_v30 = vpop.permute.xlu0 %529 }
 0x40a   :  { %690 = vmatmul.msk.bf16.vlgmr.msra.gmra.mxu2 %vm70_vm2, %v697_v7 }
 0x410   :  { %v544_v31 = vpop.permute.xlu0 %543 }
 0x41a   :  { %691 = vmatmul.msk.bf16.gmra.mxu2 %vm70_vm2, %v698_v37  ;;  %vm584_vm2 = vcmask 1042432  }
 0x48d   :  { %v480_v60 = vpop.f32.mrf.mxu2 }
 0x48e   :  { %489 = vadd.xlane.f32.xlu2 %v480_v60  ;;  %v491_v24 = vmul.f32 %v480_v60, %v480_v60 }
 0x490   :  { %492 = vadd.xlane.f32.xlu1 %v491_v24 }
 0x495   :  { %v482_v61 = vpop.f32.mrf.mxu2 }
 0x49d   :  { %v484_v37 = vpop.f32.mrf.mxu2 }
 0x4a6   :  { %572 = vperm.xlu2 %703, %v569_v25  }
 0x4a9   :  { %603 = vperm.xlu1 %705, %v600_v62  }
 0x4ae   :  { %617 = vperm.xlu2 %703, %v614_v63  }
 0x501   :  { %v490_v0 = vpop.xlane.xlu2 %489 }
 0x502   :  { %v494_v1 = vmul.f32 0.0078125, %v490_v0 }
 0x503   :  { %v493_v2 = vpop.xlane.xlu1 %492 }
 0x504   :  { %v496_v3 = vmul.f32 %v494_v1, %v494_v1  ;;  %v495_v4 = vmul.f32 0.0078125, %v493_v2 }
 0x506   :  { %v497_v20 = vsub.f32 %v495_v4, %v496_v3 }
 0x508   :  { %v498_v5 = vmax.f32 %v497_v20, 0.0 }
 0x509   :  { %v573_v59 = vpop.permute.xlu2 %572 }
 0x50a   :  { %v499_v22 = vadd.f32 1e-05, %v498_v5 }
 0x50c   :  { %722 = vrsqrt.f32 %v499_v22  ;;  %vm506_vm13 = vweird.f32 %v499_v22 }
 0x512   :  { %v723_v6 = vpop.eup %722 }
 0x513   :  { %v501_v8 = vmul.f32 %v723_v6, %v499_v22  ;;  %vm507_vm12 = vweird.f32 %v723_v6 }
 0x514   :  { %vm508_vm14 = vmor %vm506_vm13, %vm507_vm12 }
 0x515   :  { %v502_v10 = vmul.f32 %v723_v6, %v501_v8 }
 0x517   :  { %v503_v11 = vmul.f32 0.5, %v502_v10 }
 0x519   :  { %v504_v12 = vsub.f32 1.5, %v503_v11 }
 0x51b   :  { %v505_v14 = vmul.f32 %v723_v6, %v504_v12  ;;  %v604_v25 = vpop.permute.xlu1 %603 }
 0x51d   :  { %v509_v16 = vsel %vm508_vm14, %v723_v6, %v505_v14 }
 0x51e   :  { %v510_v17 = vmul.f32 %v509_v16, %v487_v13 }
 0x520   :  { %515 = vperm.xlu0 %704, %v510_v17   ;;  %v511_v18 = vmul.f32 %v510_v17, %v494_v1 }
 0x522   :  { %v512_v21 = vsub.f32 %v488_v19, %v511_v18 }
 0x528   :  { %521 = vperm.xlu0 %704, %v512_v21  }
 0x530   :  { %557 = vperm.xlu0 %704, %v554_v23  }
 0x538   :  { %580 = vperm.xlu0 %704, %v577_v26  }
 0x540   :  { %625 = vperm.xlu0 %704, %v622_v27  }
 0x548   :  { %595 = vperm.xlu0 %704, %v592_v28   ;;  %v618_v28 = vpop.permute.xlu2 %617 }
 0x550   :  { %639 = vperm.xlu0 %704, %v636_v29  }
 0x592   :  { %v516_v33 = vpop.permute.xlu0 %515 }
 0x593   :  { %v518_v35 = vmul.f32 %v516_v33, %v480_v60 }
 0x59a   :  { %v522_v36 = vpop.permute.xlu0 %521 }
 0x59b   :  { %v524_v39 = vadd.f32 %v522_v36, %v518_v35 }
 0x59d   :  { %v525_v40 = vmax.f32 %v524_v39, 0.0  ;;  %v485_v39 = vpop.f32.mrf.mxu2 }
 0x59f   :  { %v532_v34 = vmul.f32 %v530_v30, %v525_v40  ;;  %v546_v15 = vmul.f32 %v544_v31, %v525_v40 }
 0x5a1   :  { %v533_v41 = vrot.slane %v532_v34, 4  ;;  %v547_v42 = vrot.slane %v546_v15, 4 }
 0x5a2   :  { %v558_v43 = vpop.permute.xlu0 %557 }
 0x5a3   :  { %v534_v32 = vadd.f32 %v533_v41, %v532_v34  ;;  %v548_v44 = vadd.f32 %v547_v42, %v546_v15  ;;  %v560_v45 = vmul.f32 %v558_v43, %v525_v40 }
 0x5a5   :  { %v535_v38 = vrot.slane %v534_v32, 2  ;;  %v549_v46 = vrot.slane %v548_v44, 2  ;;  %v561_v47 = vrot.slane %v560_v45, 4 }
 0x5a7   :  { %v536_v48 = vadd.f32 %v535_v38, %v534_v32  ;;  %v550_v49 = vadd.f32 %v549_v46, %v548_v44  ;;  %v562_v50 = vadd.f32 %v561_v47, %v560_v45 }
 0x5a9   :  { %v537_v51 = vrot.slane %v536_v48, 1  ;;  %v551_v52 = vrot.slane %v550_v49, 1  ;;  %v563_v53 = vrot.slane %v562_v50, 2 }
 0x5aa   :  { %v581_v9 = vpop.permute.xlu0 %580 }
 0x5ab   :  { %v538_v54 = vadd.f32 %v537_v51, %v536_v48  ;;  %v552_v55 = vadd.f32 %v551_v52, %v550_v49  ;;  %v564_v56 = vadd.f32 %v563_v53, %v562_v50 }
 0x5ad   :  { %539 = vst [vmem:[#allocation3] sm:$0x1] %v538_v54  ;;  %v565_v57 = vrot.slane %v564_v56, 1 }
 0x5ae   :  { %553 = vst [vmem:[#allocation3 + $0x1] sm:$0x1] %v552_v55 }
 0x5af   :  { %v566_v58 = vadd.f32 %v565_v57, %v564_v56 }
 0x5b1   :  { %567 = vst [vmem:[#allocation3 + $0x2] sm:$0x1] %v566_v58 }
 0x5b2   :  { %v626_v24 = vpop.permute.xlu0 %625 }
 0x5b8   :  { %v568_v7 = vld [vmem:[#allocation3] sm:$0x7] }
 0x5b9   :  { %v575_v60 = vadd.f32 %v573_v59, %v568_v7 }
 0x5ba   :  { %v596_v22 = vpop.permute.xlu0 %595 }
 0x5bb   :  { %724 = vtanh.f32 %v575_v60 }
 0x5c1   :  { %v725_v61 = vpop.eup %724 }
 0x5c2   :  { %v583_v62 = vmul.f32 %v725_v61, %v581_v9  ;;  %v606_v63 = vmul.f32 %v725_v61, %v604_v25  ;;  %v628_v0 = vmul.f32 %v725_v61, %v626_v24  ;;  %v640_v29 = vpop.permute.xlu0 %639 }
 0x5c4   :  { %v585_v1 = vsel %vm584_vm2, %v583_v62, 0.0  ;;  %v607_v2 = vsel %vm584_vm2, %v606_v63, 0.0  ;;  %v629_v3 = vsel %vm584_vm2, %v628_v0, 0.0 }
 0x5c5   :  { %v586_v4 = vrot.slane %v585_v1, 4  ;;  %v608_v20 = vrot.slane %v607_v2, 4  ;;  %v630_v5 = vrot.slane %v629_v3, 4 }
 0x5c7   :  { %v587_v6 = vadd.f32 %v586_v4, %v585_v1  ;;  %v609_v8 = vadd.f32 %v608_v20, %v607_v2  ;;  %v631_v10 = vadd.f32 %v630_v5, %v629_v3 }
 0x5c9   :  { %v588_v11 = vrot.slane %v587_v6, 2  ;;  %v610_v12 = vrot.slane %v609_v8, 2  ;;  %v632_v13 = vrot.slane %v631_v10, 2 }
 0x5cb   :  { %v611_v14 = vadd.f32 %v610_v12, %v609_v8  ;;  %v589_v16 = vadd.f32 %v588_v11, %v587_v6  ;;  %v633_v17 = vadd.f32 %v632_v13, %v631_v10 }
 0x5cd   :  { %v612_v18 = vrot.slane %v611_v14, 1  ;;  %v590_v19 = vrot.slane %v589_v16, 1  ;;  %v634_v21 = vrot.slane %v633_v17, 1 }
 0x5cf   :  { %v613_v23 = vadd.f32 %v612_v18, %v611_v14  ;;  %v591_v26 = vadd.f32 %v590_v19, %v589_v16  ;;  %v635_v27 = vadd.f32 %v634_v21, %v633_v17 }
 0x5d1   :  { %v620_v30 = vadd.f32 %v618_v28, %v613_v23  ;;  %v598_v31 = vadd.f32 %v596_v22, %v591_v26  ;;  %v642_v33 = vadd.f32 %v640_v29, %v635_v27 }
 0x5d3   :  { %621 = vst [vmem:[#allocation3 + $0x1] sm:$0x1] %v620_v30 }
 0x5d4   :  { %599 = vst [vmem:[#allocation3] sm:$0x1] %v598_v31 }
 0x5d5   :  { %643 = vst [vmem:[#allocation3 + $0x2] sm:$0x1] %v642_v33 }
 0x5dc   :  { %v647_v35 = vld [vmem:[#allocation3] sm:$0x7] }
 0x5dd   :  { %v644_v36 = vld [vmem:[#allocation3] sm:$0x7]  ;;  %649 = vrot.lane.b32.xlu1 %v647_v35, %s726_s16 }
 0x5de   :  { %646 = vst.msk [vmem:[%s967_s3] sm:$0x7] %vm645_vm15, %v644_v36 }
 0x64f   :  { %v650_v40 = vpop.permute.xlu1 %649 }
 0x650   :  { %692 = vst.msk [vmem:[%s967_s3 + $0x4] sm:$0x7] %vm645_vm15, %v650_v40 }

</bundles_post_ra>
